<compile_context>
chip_gen: v5e
topology: v5e:2x2
jax: 0.10.0
libtpu: 0.0.40
codegen_flags: <defaults>
</compile_context>

<pallas_src>
import functools
import math

import jax
import jax.numpy as jnp
import numpy as np
from jax.experimental import pallas as pl
from jax.experimental.pallas import tpu as pltpu


# --------------------------------------------------------------------------- #
# Pallas kernel
# --------------------------------------------------------------------------- #
def _embed_kernel(ids_ref, emb_ref, o_ref, *, scale):
    """Scaled embedding lookup for one tile of flattened token ids.

    ids_ref : (TM, 1)  int32   token ids for this row tile
    emb_ref : (A, D)   float32 full embedding table (VMEM resident)
    o_ref   : (TM, D)  float32 output tile
    """
    ids = ids_ref[...]                                    # (TM, 1)
    tm = ids.shape[0]
    a = emb_ref.shape[0]
    # one_hot[r, v] = 1.0 iff ids[r] == v   (exact selection matrix)
    vocab_iota = jax.lax.broadcasted_iota(jnp.int32, (tm, a), 1)
    onehot = (vocab_iota == ids).astype(emb_ref.dtype)    # (TM, A)
    # gather via MXU matmul, then apply sqrt(d_model) scale
    o_ref[...] = jnp.dot(onehot, emb_ref[...],
                         preferred_element_type=jnp.float32) * scale


# --------------------------------------------------------------------------- #
# Wrapper
# --------------------------------------------------------------------------- #
def input_embeddings_2d(tokens, emb_table, *, row_tile=256):
    """tokens: (B, L) int ids; emb_table: (action_size, d_model) f32.

    Returns (B, L, d_model) f32 = embedding(tokens) * sqrt(d_model).
    """
    B, L = tokens.shape
    A, D = emb_table.shape
    scale = math.sqrt(D)

    # Flatten batch*seq into one row axis and pad to a sublane-aligned tile.
    N = B * L
    if N >= row_tile:
        TM = row_tile
    else:
        TM = max(8, ((N + 7) // 8) * 8)
    N_pad = ((N + TM - 1) // TM) * TM

    ids = tokens.reshape(N).astype(jnp.int32)
    ids = jnp.pad(ids, (0, N_pad - N))        # padded rows read row 0, sliced off
    ids2 = ids.reshape(N_pad, 1)

    grid = (N_pad // TM,)
    out = pl.pallas_call(
        functools.partial(_embed_kernel, scale=scale),
        out_shape=jax.ShapeDtypeStruct((N_pad, D), jnp.float32),
        grid=grid,
        in_specs=[
            pl.BlockSpec((TM, 1), lambda i: (i, 0)),   # token-id tile
            pl.BlockSpec((A, D), lambda i: (0, 0)),    # full embedding table
        ],
        out_specs=pl.BlockSpec((TM, D), lambda i: (i, 0)),
        compiler_params=pltpu.CompilerParams(
            dimension_semantics=("parallel",)),
        cost_estimate=pl.CostEstimate(
            flops=2 * N_pad * A * D,
            transcendentals=0,
            bytes_accessed=N_pad * 4 + A * D * 4 + N_pad * D * 4),
    )(ids2, emb_table)

    return out[:N].reshape(B, L, D)


# --------------------------------------------------------------------------- #
if __name__ == "__main__":
    d_model = 32
    action_size = 10
    B, L = 2, 8

    key = jax.random.PRNGKey(0)
    wkey, tkey = jax.random.split(key)
    emb_table = jax.random.normal(wkey, (action_size, d_model), jnp.float32) * 0.05
    tokens = jax.random.randint(tkey, (B, L), 0, action_size, dtype=jnp.int32)

    out = input_embeddings_2d(tokens, emb_table)
    out = jax.block_until_ready(out)

    # pure-JAX reference: embedding(x) * sqrt(d_model)
    ref = jnp.take(emb_table, tokens, axis=0) * math.sqrt(d_model)
    assert out.shape == (B, L, d_model) and out.dtype == jnp.float32
    np.testing.assert_allclose(np.asarray(out), np.asarray(ref), rtol=1e-6, atol=1e-6)
    print("KERNEL_OK")
</pallas_src>

<mosaic_0001>
module attributes {stable_mosaic.version = 11 : i64} {
  func.func @_embed_kernel(%arg0: i32, %arg1: memref<16x1xi32, #tpu.memory_space<vmem>>, %arg2: memref<10x32xf32, #tpu.memory_space<vmem>>, %arg3: memref<16x32xf32, #tpu.memory_space<vmem>>) attributes {dimension_semantics = [#tpu.dimension_semantics<parallel>], iteration_bounds = array<i64: 1>, scalar_prefetch = 0 : i64, scratch_operands = 0 : i64, tpu.core_type = #tpu.core_type<tc>, window_params = [{transform_indices = @transform_0, window_bounds = array<i64: 16, 1>}, {pipeline_mode = #tpu.pipeline_mode<synchronous>, transform_indices = @transform_1, window_bounds = array<i64: 10, 32>}, {transform_indices = @transform_2, window_bounds = array<i64: 16, 32>}]} {
    %c0 = arith.constant 0 : index
    %c0_0 = arith.constant 0 : index
    %0 = vector.load %arg1[%c0, %c0_0] : memref<16x1xi32, #tpu.memory_space<vmem>>, vector<16x1xi32>
    %1 = tpu.iota {dimensions = array<i32: 1>} : vector<16x10xi32>
    %2 = vector.broadcast %0 : vector<16x1xi32> to vector<16x10xi32>
    %3 = arith.cmpi eq, %1, %2 : vector<16x10xi32>
    %4 = arith.extui %3 : vector<16x10xi1> to vector<16x10xi32>
    %5 = arith.sitofp %4 : vector<16x10xi32> to vector<16x10xf32>
    %c0_1 = arith.constant 0 : index
    %c0_2 = arith.constant 0 : index
    %6 = vector.load %arg2[%c0_1, %c0_2] : memref<10x32xf32, #tpu.memory_space<vmem>>, vector<10x32xf32>
    %cst = arith.constant dense<0.000000e+00> : vector<16x32xf32>
    %7 = tpu.matmul %5, %6, %cst {dimension_numbers = #tpu.dot_dimension_numbers<[1], [0], [0], [1], [0, 0, 1, 1], [], []>} : vector<16x10xf32>, vector<10x32xf32>, vector<16x32xf32> -> vector<16x32xf32>
    %cst_3 = arith.constant 5.65685415 : f32
    %8 = vector.broadcast %cst_3 : f32 to vector<16x32xf32>
    %9 = arith.mulf %7, %8 : vector<16x32xf32>
    %c0_4 = arith.constant 0 : index
    %c0_5 = arith.constant 0 : index
    %10 = vector.load %arg3[%c0_4, %c0_5] : memref<16x32xf32, #tpu.memory_space<vmem>>, vector<16x32xf32>
    tpu.vector_store %arg3[%c0_4, %c0_5], %9 {strides = array<i32>} : memref<16x32xf32, #tpu.memory_space<vmem>>, vector<16x32xf32>,
    return
  }
  func.func @transform_0(%arg0: i32) -> (i32, i32) {
    %c0_i32 = arith.constant 0 : i32
    %c0_i32_0 = arith.constant 0 : i32
    return %arg0, %c0_i32 : i32, i32
  }
  func.func @transform_1(%arg0: i32) -> (i32, i32) {
    %c0_i32 = arith.constant 0 : i32
    %c0_i32_0 = arith.constant 0 : i32
    %c0_i32_1 = arith.constant 0 : i32
    return %c0_i32, %c0_i32_0 : i32, i32
  }
  func.func @transform_2(%arg0: i32) -> (i32, i32) {
    %c0_i32 = arith.constant 0 : i32
    %c0_i32_0 = arith.constant 0 : i32
    return %arg0, %c0_i32 : i32, i32
  }
}

</mosaic_0001>

<bundles_post_ra>
// kernel: tpu_custom_call.1
= control target key start
LH: loop header
LB: loop body
LE: loop exit
PB: predicated region body
PF: predicated region fallthrough
CT: control target
= control target key end

     0   :  { %vm37_vm0 = vcmask 1041408   ;;  %v126_v2 = vmov 0   ;;  %s161_s0 = inlined_call_operand.vmem [shape: s32[16,1], index: 0, kind: input, shape index: {}]   ;;  %s162_s1 = inlined_call_operand.vmem [shape: f32[10,32], index: 1, kind: input, shape index: {}]   ;;  %s163_s2 = inlined_call_operand.hbm [shape: f32[16,32], index: 2, kind: output, shape index: {}]  }
   0x1   :  { %v12_v0 = vld [vmem:[%s161_s0] sm:$0xff]  ;;  %v29_v1 = vld [vmem:[%s162_s1 + $0x8] sm:$0x3]  ;;  %99 = vset.pattern.permute.xlu0 %v126_v2 }
   0x2   :  { %89 = vmatpush.msk.msra.mxu0 %vm37_vm0, %v29_v1 }
   0x3   :  { %7 = vsyncpa [#allocation3], 0  ;;  %17 = vperm.xlu0 %99, %v12_v0   ;;  %92 = vmatpush.msk.msra.mxu1 %vm37_vm0, %v29_v1  ;;  %v13_v3 = vld [vmem:[%s161_s0 + $0x8] sm:$0xff]  ;;  %v28_v4 = vld [vmem:[%s162_s1] sm:$0xff]  ;;  %v14_v5 = vlaneseq  ;;  %vm30_vm1 = vcmask 80896   ;;  %v127_v8 = vmov 0.0  }
   0x4   :  { %56 = vmatpush.msra.mxu0 %v28_v4  ;;  %vm66_vm4 = vcmask 261120   ;;  %s128_s0 = smov [#allocation2]   ;;  %s75_s19 = sshll.u32 %s163_s2, 4  ;;  %s76_s19 = int_to_ptr.hbm [resolvable:$true] %s75_s19 }
   0x5   :  { %93 = vmatpush.msra.mxu1 %v28_v4  ;;  %v15_v6 = vand.u32 127, %v14_v5  ;;  %s73_s1 = sshll.u32 %s128_s0, 4  ;;  %s129_s20 = smov 128   ;;  %s74_s1 = int_to_ptr.vmem [resolvable:$true] %s73_s1 }
   0x6   :  { %s130_s21 = smov 8  }
   0xb   :  { %20 = vperm.xlu0 %99, %v13_v3  }
  0x75   :  { %v18_v7 = vpop.permute.xlu0 %17 }
  0x76   :  { %vm22_vm2 = vcmp.eq.s32.totalorder %v15_v6, %v18_v7 }
  0x77   :  { %v87_v9 = vsel %vm22_vm2, 1.0, %v127_v8 }
  0x78   :  { %90 = vmatmul.msk.f32.vlgmr.msra.gmra.mxu0 %vm30_vm1, %v87_v9 }
  0x7d   :  { %v21_v10 = vpop.permute.xlu0 %20 }
  0x7e   :  { %vm23_vm3 = vcmp.eq.s32.totalorder %v15_v6, %v21_v10 }
  0x7f   :  { %v88_v11 = vsel %vm23_vm3, 1.0, %v127_v8 }
  0x80   :  { %91 = vmatmul.msk.f32.vlgmr.msra.gmra.mxu1 %vm30_vm1, %v88_v11 }
  0xf5   :  { %v58_v12 = vpop.f32.mrf.mxu0 }
  0xf6   :  { %v64_v13 = vmul.f32 5.656854, %v58_v12 }
  0xf8   :  { %67 = vst.msk [vmem:[#allocation2] sm:$0xff] %vm66_vm4, %v64_v13 }
  0xfd   :  { %v61_v14 = vpop.f32.mrf.mxu1 }
  0xfe   :  { %v65_v15 = vmul.f32 5.656854, %v61_v14 }
 0x100   :  { %68 = vst.msk [vmem:[#allocation2 + $0x8] sm:$0xff] %vm66_vm4, %v65_v15 }
 0x101   :  { %81 = dma.vmem_to_hbm [thread:$0]  %s74_s1, 256, %s76_s19, [#allocation3], %s129_s20, %s129_s20, %s130_s21  }
 0x102   :  { %124 = dma.done.wait [#allocation3], 256  }
 0x103   :  { %125 = vsyncadd [#allocation3], 4294967040 }
 0x104   :  { %86 = vsyncpa [#allocation3], 1 }

</bundles_post_ra>
